<compile_context>
chip_gen: v5e
topology: v5e:2x2
jax: 0.10.0
libtpu: 0.0.40
codegen_flags: <defaults>
</compile_context>

<pallas_src>
import functools

import jax
import jax.numpy as jnp
from jax.experimental import pallas as pl
from jax.experimental.pallas import tpu as pltpu


def _elmo_block_kernel(x_ref, h_ref, w_ref, b_ref, gamma_ref, beta_ref,
                       out_ref, newh_ref, *, hidden, eps):
    H = hidden
    x = x_ref[...]                                    # (TB, H) f32
    h = h_ref[...]                                    # (TB, H) f32

    # --- Fused GRU gate matmul: one MXU pass on bf16 operands, f32 accumulate ---
    xh = jnp.concatenate([x.astype(w_ref.dtype), h.astype(w_ref.dtype)], axis=-1)
    g = jnp.dot(xh, w_ref[...], preferred_element_type=jnp.float32) + b_ref[...]

    r = jax.nn.sigmoid(g[:, 0 * H:1 * H])             # sigma(i_r + h_r + b)
    z = jax.nn.sigmoid(g[:, 1 * H:2 * H])             # sigma(i_z + h_z + b)
    n = jnp.tanh(g[:, 2 * H:3 * H] + r * g[:, 3 * H:4 * H])
    new_h = (1.0 - z) * n + z * h                     # (TB, H) f32

    # --- LayerNorm over last dim, single-pass statistics ---
    inv_h = 1.0 / H
    mean = jnp.sum(new_h, axis=-1, keepdims=True) * inv_h
    meansq = jnp.sum(new_h * new_h, axis=-1, keepdims=True) * inv_h
    var = meansq - mean * mean
    ln = (new_h - mean) * jax.lax.rsqrt(var + eps) * gamma_ref[...] + beta_ref[...]

    # --- Dropout (eval mode => identity) + residual ---
    out_ref[...] = x + ln
    newh_ref[...] = new_h


def prepare_elmo_params(w_ih, w_hh, b_ih, b_hh, gamma, beta,
                        *, mxu_dtype=jnp.bfloat16):
    """One-time (init-time) packing of torch-layout GRUCell/LayerNorm weights.

    w_ih, w_hh: (3H, H) torch layout (gate order r, z, n). b_ih, b_hh: (3H,).
    Returns kernel-ready params: packed (2H, 4H) weight (mxu_dtype), (1, 4H)
    f32 bias, (1, H) f32 gamma/beta.
    """
    H = w_ih.shape[1]
    w_ih = w_ih.astype(jnp.float32)
    w_hh = w_hh.astype(jnp.float32)
    w_ir, w_iz, w_in = w_ih[:H], w_ih[H:2 * H], w_ih[2 * H:]
    w_hr, w_hz, w_hn = w_hh[:H], w_hh[H:2 * H], w_hh[2 * H:]
    zeros = jnp.zeros((H, H), jnp.float32)
    top = jnp.concatenate([w_ir.T, w_iz.T, w_in.T, zeros], axis=1)   # x rows
    bot = jnp.concatenate([w_hr.T, w_hz.T, zeros, w_hn.T], axis=1)   # h rows
    w = jnp.concatenate([top, bot], axis=0).astype(mxu_dtype)        # (2H, 4H)

    b_ih = b_ih.astype(jnp.float32)
    b_hh = b_hh.astype(jnp.float32)
    b = jnp.concatenate([b_ih[:2 * H] + b_hh[:2 * H],   # folded r/z biases
                         b_ih[2 * H:],                  # b_in
                         b_hh[2 * H:]])                 # b_hn (kept separate: r * (h_n + b_hn))
    return {
        "w": w,
        "b": b.reshape(1, 4 * H),
        "gamma": gamma.astype(jnp.float32).reshape(1, H),
        "beta": beta.astype(jnp.float32).reshape(1, H),
    }


@functools.partial(jax.jit, static_argnames=("eps", "block_batch"))
def elmo_block(x, h, params, *, eps=1e-5, block_batch=256):
    """x, h: (B, H) f32. params: from prepare_elmo_params. Returns (output, current_h)."""
    B, H = x.shape
    w, b, gamma, beta = params["w"], params["b"], params["gamma"], params["beta"]

    tb = min(block_batch, B)                 # TB multiple of 8 (or == B)
    grid = (pl.cdiv(B, tb),)

    # VMEM budget: resident weights + double-buffered activation tiles (+ headroom),
    # clamped to 64 MiB so the same plan stays valid on v7x.
    act_bytes = 4 * tb * H * 4 * 2
    wgt_bytes = w.size * w.dtype.itemsize + b.size * 4 + 2 * H * 4
    vmem_limit = min(max(wgt_bytes + act_bytes + (8 << 20), 32 << 20), 64 << 20)

    row_spec = pl.BlockSpec((tb, H), lambda i: (i, 0))
    resident = lambda shape: pl.BlockSpec(shape, lambda i: (0, 0))

    kernel = functools.partial(_elmo_block_kernel, hidden=H, eps=eps)
    out, new_h = pl.pallas_call(
        kernel,
        out_shape=(jax.ShapeDtypeStruct((B, H), jnp.float32),
                   jax.ShapeDtypeStruct((B, H), jnp.float32)),
        grid=grid,
        in_specs=[row_spec,                 # x
                  row_spec,                 # h
                  resident(w.shape),        # packed GRU weight (stays in VMEM)
                  resident(b.shape),        # packed bias
                  resident(gamma.shape),    # LN gamma
                  resident(beta.shape)],    # LN beta
        out_specs=(row_spec, row_spec),
        compiler_params=pltpu.CompilerParams(
            dimension_semantics=("parallel",),
            vmem_limit_bytes=vmem_limit),
    )(x.astype(jnp.float32), h.astype(jnp.float32), w, b, gamma, beta)
    return out, new_h


def reference_elmo_block(x, h, w_ih, w_hh, b_ih, b_hh, gamma, beta,
                         eps=1e-5, mxu_dtype=jnp.bfloat16):
    """Pure-JAX reference mirroring torch.nn.GRUCell + LayerNorm (eval dropout),
    with matmul operands cast to the same MXU dtype as the kernel."""
    H = x.shape[1]
    gi = jnp.dot(x.astype(mxu_dtype), w_ih.T.astype(mxu_dtype),
                 preferred_element_type=jnp.float32) + b_ih
    gh = jnp.dot(h.astype(mxu_dtype), w_hh.T.astype(mxu_dtype),
                 preferred_element_type=jnp.float32) + b_hh
    r = jax.nn.sigmoid(gi[:, :H] + gh[:, :H])
    z = jax.nn.sigmoid(gi[:, H:2 * H] + gh[:, H:2 * H])
    n = jnp.tanh(gi[:, 2 * H:] + r * gh[:, 2 * H:])
    new_h = (1.0 - z) * n + z * h
    mean = new_h.mean(-1, keepdims=True)
    var = ((new_h - mean) ** 2).mean(-1, keepdims=True)
    ln = (new_h - mean) * jax.lax.rsqrt(var + eps) * gamma + beta
    return x + ln, new_h


if __name__ == "__main__":
    B, H = 8, 32          # batch, hidden_size (norm_size == hidden_size)
    key = jax.random.PRNGKey(0)
    kx, kh, k1, k2, k3, k4 = jax.random.split(key, 6)

    x = jax.random.normal(kx, (B, H), dtype=jnp.float32)
    h = jax.random.normal(kh, (B, H), dtype=jnp.float32)

    # torch.nn.GRUCell default init: U(-1/sqrt(H), 1/sqrt(H))
    bound = 1.0 / (H ** 0.5)
    w_ih = jax.random.uniform(k1, (3 * H, H), minval=-bound, maxval=bound, dtype=jnp.float32)
    w_hh = jax.random.uniform(k2, (3 * H, H), minval=-bound, maxval=bound, dtype=jnp.float32)
    b_ih = jax.random.uniform(k3, (3 * H,), minval=-bound, maxval=bound, dtype=jnp.float32)
    b_hh = jax.random.uniform(k4, (3 * H,), minval=-bound, maxval=bound, dtype=jnp.float32)

    # torch.nn.LayerNorm default init
    gamma = jnp.ones((H,), dtype=jnp.float32)
    beta = jnp.zeros((H,), dtype=jnp.float32)

    # One-time weight packing (would live at model init in real use).
    params = prepare_elmo_params(w_ih, w_hh, b_ih, b_hh, gamma, beta)

    out, new_h = elmo_block(x, h, params)
    jax.block_until_ready((out, new_h))

    ref_out, ref_new_h = reference_elmo_block(x, h, w_ih, w_hh, b_ih, b_hh, gamma, beta)
    assert jnp.allclose(new_h, ref_new_h, atol=5e-4, rtol=5e-4), \
        f"new_h max err {float(jnp.max(jnp.abs(new_h - ref_new_h)))}"
    assert jnp.allclose(out, ref_out, atol=5e-4, rtol=5e-4), \
        f"out max err {float(jnp.max(jnp.abs(out - ref_out)))}"

    print("KERNEL_OK")
</pallas_src>

<mosaic_0001>
module attributes {stable_mosaic.version = 11 : i64} {
  func.func @_elmo_block_kernel(%arg0: i32, %arg1: memref<8x32xf32, #tpu.memory_space<vmem>>, %arg2: memref<8x32xf32, #tpu.memory_space<vmem>>, %arg3: memref<64x128xbf16, #tpu.memory_space<vmem>>, %arg4: memref<1x128xf32, #tpu.memory_space<vmem>>, %arg5: memref<1x32xf32, #tpu.memory_space<vmem>>, %arg6: memref<1x32xf32, #tpu.memory_space<vmem>>, %arg7: memref<8x32xf32, #tpu.memory_space<vmem>>, %arg8: memref<8x32xf32, #tpu.memory_space<vmem>>) attributes {dimension_semantics = [#tpu.dimension_semantics<parallel>], iteration_bounds = array<i64: 1>, scalar_prefetch = 0 : i64, scratch_operands = 0 : i64, tpu.core_type = #tpu.core_type<tc>, window_params = [{transform_indices = @transform_0, window_bounds = array<i64: 8, 32>}, {transform_indices = @transform_1, window_bounds = array<i64: 8, 32>}, {pipeline_mode = #tpu.pipeline_mode<synchronous>, transform_indices = @transform_2, window_bounds = array<i64: 64, 128>}, {pipeline_mode = #tpu.pipeline_mode<synchronous>, transform_indices = @transform_3, window_bounds = array<i64: 1, 128>}, {pipeline_mode = #tpu.pipeline_mode<synchronous>, transform_indices = @transform_4, window_bounds = array<i64: 1, 32>}, {pipeline_mode = #tpu.pipeline_mode<synchronous>, transform_indices = @transform_5, window_bounds = array<i64: 1, 32>}, {transform_indices = @transform_6, window_bounds = array<i64: 8, 32>}, {transform_indices = @transform_7, window_bounds = array<i64: 8, 32>}]} {
    %c0 = arith.constant 0 : index
    %c0_0 = arith.constant 0 : index
    %0 = vector.load %arg1[%c0, %c0_0] : memref<8x32xf32, #tpu.memory_space<vmem>>, vector<8x32xf32>
    %c0_1 = arith.constant 0 : index
    %c0_2 = arith.constant 0 : index
    %1 = vector.load %arg2[%c0_1, %c0_2] : memref<8x32xf32, #tpu.memory_space<vmem>>, vector<8x32xf32>
    %2 = arith.truncf %0 : vector<8x32xf32> to vector<8x32xbf16>
    %3 = arith.truncf %1 : vector<8x32xf32> to vector<8x32xbf16>
    %4 = tpu.concatenate %2, %3 in 1 : vector<8x32xbf16>, vector<8x32xbf16> -> vector<8x64xbf16>
    %c0_3 = arith.constant 0 : index
    %c0_4 = arith.constant 0 : index
    %5 = vector.load %arg3[%c0_3, %c0_4] : memref<64x128xbf16, #tpu.memory_space<vmem>>, vector<64x128xbf16>
    %cst = arith.constant dense<0.000000e+00> : vector<8x128xf32>
    %6 = tpu.matmul %4, %5, %cst {dimension_numbers = #tpu.dot_dimension_numbers<[1], [0], [0], [1], [0, 0, 1, 1], [], []>} : vector<8x64xbf16>, vector<64x128xbf16>, vector<8x128xf32> -> vector<8x128xf32>
    %c0_5 = arith.constant 0 : index
    %c0_6 = arith.constant 0 : index
    %7 = vector.load %arg4[%c0_5, %c0_6] : memref<1x128xf32, #tpu.memory_space<vmem>>, vector<1x128xf32>
    %8 = vector.broadcast %7 : vector<1x128xf32> to vector<8x128xf32>
    %9 = arith.addf %6, %8 : vector<8x128xf32>
    %10 = vector.extract_strided_slice %9 {offsets = [0, 0], sizes = [8, 32], strides = [1, 1]} : vector<8x128xf32> to vector<8x32xf32>
    %11 = arith.negf %10 : vector<8x32xf32>
    %12 = math.exp %11 : vector<8x32xf32>
    %cst_7 = arith.constant 1.000000e+00 : f32
    %13 = vector.broadcast %cst_7 : f32 to vector<8x32xf32>
    %14 = arith.addf %13, %12 : vector<8x32xf32>
    %15 = arith.divf %13, %14 : vector<8x32xf32>
    %16 = vector.extract_strided_slice %9 {offsets = [0, 32], sizes = [8, 32], strides = [1, 1]} : vector<8x128xf32> to vector<8x32xf32>
    %17 = arith.negf %16 : vector<8x32xf32>
    %18 = math.exp %17 : vector<8x32xf32>
    %cst_8 = arith.constant 1.000000e+00 : f32
    %19 = vector.broadcast %cst_8 : f32 to vector<8x32xf32>
    %20 = arith.addf %19, %18 : vector<8x32xf32>
    %21 = arith.divf %19, %20 : vector<8x32xf32>
    %22 = vector.extract_strided_slice %9 {offsets = [0, 64], sizes = [8, 32], strides = [1, 1]} : vector<8x128xf32> to vector<8x32xf32>
    %23 = vector.extract_strided_slice %9 {offsets = [0, 96], sizes = [8, 32], strides = [1, 1]} : vector<8x128xf32> to vector<8x32xf32>
    %24 = arith.mulf %15, %23 : vector<8x32xf32>
    %25 = arith.addf %22, %24 : vector<8x32xf32>
    %26 = math.tanh %25 : vector<8x32xf32>
    %cst_9 = arith.constant 1.000000e+00 : f32
    %27 = vector.broadcast %cst_9 : f32 to vector<8x32xf32>
    %28 = arith.subf %27, %21 : vector<8x32xf32>
    %29 = arith.mulf %28, %26 : vector<8x32xf32>
    %30 = arith.mulf %21, %1 : vector<8x32xf32>
    %31 = arith.addf %29, %30 : vector<8x32xf32>
    %cst_10 = arith.constant dense<0.000000e+00> : vector<8xf32>
    %32 = vector.multi_reduction <add>, %31, %cst_10 [1] : vector<8x32xf32> to vector<8xf32>
    %33 = vector.shape_cast %32 : vector<8xf32> to vector<8x1xf32>
    %cst_11 = arith.constant 3.125000e-02 : f32
    %34 = vector.broadcast %cst_11 : f32 to vector<8x1xf32>
    %35 = arith.mulf %33, %34 : vector<8x1xf32>
    %36 = arith.mulf %31, %31 : vector<8x32xf32>
    %cst_12 = arith.constant dense<0.000000e+00> : vector<8xf32>
    %37 = vector.multi_reduction <add>, %36, %cst_12 [1] : vector<8x32xf32> to vector<8xf32>
    %38 = vector.shape_cast %37 : vector<8xf32> to vector<8x1xf32>
    %cst_13 = arith.constant 3.125000e-02 : f32
    %39 = vector.broadcast %cst_13 : f32 to vector<8x1xf32>
    %40 = arith.mulf %38, %39 : vector<8x1xf32>
    %41 = arith.mulf %35, %35 : vector<8x1xf32>
    %42 = arith.subf %40, %41 : vector<8x1xf32>
    %43 = vector.broadcast %35 : vector<8x1xf32> to vector<8x32xf32>
    %44 = arith.subf %31, %43 : vector<8x32xf32>
    %cst_14 = arith.constant 9.99999974E-6 : f32
    %45 = vector.broadcast %cst_14 : f32 to vector<8x1xf32>
    %46 = arith.addf %42, %45 : vector<8x1xf32>
    %47 = math.rsqrt %46 : vector<8x1xf32>
    %48 = vector.broadcast %47 : vector<8x1xf32> to vector<8x32xf32>
    %49 = arith.mulf %44, %48 : vector<8x32xf32>
    %c0_15 = arith.constant 0 : index
    %c0_16 = arith.constant 0 : index
    %50 = vector.load %arg5[%c0_15, %c0_16] : memref<1x32xf32, #tpu.memory_space<vmem>>, vector<1x32xf32>
    %51 = vector.broadcast %50 : vector<1x32xf32> to vector<8x32xf32>
    %52 = arith.mulf %49, %51 : vector<8x32xf32>
    %c0_17 = arith.constant 0 : index
    %c0_18 = arith.constant 0 : index
    %53 = vector.load %arg6[%c0_17, %c0_18] : memref<1x32xf32, #tpu.memory_space<vmem>>, vector<1x32xf32>
    %54 = vector.broadcast %53 : vector<1x32xf32> to vector<8x32xf32>
    %55 = arith.addf %52, %54 : vector<8x32xf32>
    %56 = arith.addf %0, %55 : vector<8x32xf32>
    %c0_19 = arith.constant 0 : index
    %c0_20 = arith.constant 0 : index
    %57 = vector.load %arg7[%c0_19, %c0_20] : memref<8x32xf32, #tpu.memory_space<vmem>>, vector<8x32xf32>
    tpu.vector_store %arg7[%c0_19, %c0_20], %56 {strides = array<i32>} : memref<8x32xf32, #tpu.memory_space<vmem>>, vector<8x32xf32>,
    %c0_21 = arith.constant 0 : index
    %c0_22 = arith.constant 0 : index
    %58 = vector.load %arg8[%c0_21, %c0_22] : memref<8x32xf32, #tpu.memory_space<vmem>>, vector<8x32xf32>
    tpu.vector_store %arg8[%c0_21, %c0_22], %31 {strides = array<i32>} : memref<8x32xf32, #tpu.memory_space<vmem>>, vector<8x32xf32>,
    return
  }
  func.func @transform_0(%arg0: i32) -> (i32, i32) {
    %c0_i32 = arith.constant 0 : i32
    %c0_i32_0 = arith.constant 0 : i32
    return %arg0, %c0_i32 : i32, i32
  }
  func.func @transform_1(%arg0: i32) -> (i32, i32) {
    %c0_i32 = arith.constant 0 : i32
    %c0_i32_0 = arith.constant 0 : i32
    return %arg0, %c0_i32 : i32, i32
  }
  func.func @transform_2(%arg0: i32) -> (i32, i32) {
    %c0_i32 = arith.constant 0 : i32
    %c0_i32_0 = arith.constant 0 : i32
    %c0_i32_1 = arith.constant 0 : i32
    return %c0_i32, %c0_i32_0 : i32, i32
  }
  func.func @transform_3(%arg0: i32) -> (i32, i32) {
    %c0_i32 = arith.constant 0 : i32
    %c0_i32_0 = arith.constant 0 : i32
    %c0_i32_1 = arith.constant 0 : i32
    return %c0_i32, %c0_i32_0 : i32, i32
  }
  func.func @transform_4(%arg0: i32) -> (i32, i32) {
    %c0_i32 = arith.constant 0 : i32
    %c0_i32_0 = arith.constant 0 : i32
    %c0_i32_1 = arith.constant 0 : i32
    return %c0_i32, %c0_i32_0 : i32, i32
  }
  func.func @transform_5(%arg0: i32) -> (i32, i32) {
    %c0_i32 = arith.constant 0 : i32
    %c0_i32_0 = arith.constant 0 : i32
    %c0_i32_1 = arith.constant 0 : i32
    return %c0_i32, %c0_i32_0 : i32, i32
  }
  func.func @transform_6(%arg0: i32) -> (i32, i32) {
    %c0_i32 = arith.constant 0 : i32
    %c0_i32_0 = arith.constant 0 : i32
    return %arg0, %c0_i32 : i32, i32
  }
  func.func @transform_7(%arg0: i32) -> (i32, i32) {
    %c0_i32 = arith.constant 0 : i32
    %c0_i32_0 = arith.constant 0 : i32
    return %arg0, %c0_i32 : i32, i32
  }
}

</mosaic_0001>

<bundles_post_ra>
// kernel: elmo_block.1
= control target key start
LH: loop header
LB: loop body
LE: loop exit
PB: predicated region body
PF: predicated region fallthrough
CT: control target
= control target key end

     0   :  { %13 = vsyncpa [#allocation3], 0  ;;  %s573_s0 = inlined_call_operand.hbm [shape: f32[8,32], index: 0, kind: input, shape index: {}]   ;;  %s574_s1 = inlined_call_operand.hbm [shape: f32[8,32], index: 1, kind: input, shape index: {}]   ;;  %s575_s2 = inlined_call_operand.hbm [shape: bf16[64,128], index: 2, kind: input, shape index: {}]   ;;  %s576_s3 = inlined_call_operand.vmem [shape: f32[1,128], index: 3, kind: input, shape index: {}]   ;;  %s577_s4 = inlined_call_operand.vmem [shape: f32[1,32], index: 4, kind: input, shape index: {}]   ;;  %s578_s5 = inlined_call_operand.hbm [shape: f32[1,32], index: 5, kind: input, shape index: {}]   ;;  %s579_s6 = inlined_call_operand.hbm [shape: f32[8,32], index: 6, kind: output, shape index: {0}]   ;;  %s580_s7 = inlined_call_operand.hbm [shape: f32[8,32], index: 7, kind: output, shape index: {1}]  }
   0x1   :  { %14 = vsyncpa [#allocation6], 0 }
   0x2   :  { %15 = vsyncpa [#allocation9], 0 }
   0x3   :  { %16 = vsyncpa [#allocation4], 0  ;;  %s34_s26 = sshll.u32 %s574_s1, 4  ;;  %s35_s26 = int_to_ptr.hbm [resolvable:$true] %s34_s26 }
   0x4   :  { %17 = vsyncpa [#allocation12], 0  ;;  %s477_s27 = smov [#allocation5]   ;;  %s23_s8 = sshll.u32 %s573_s0, 4  ;;  %s24_s8 = int_to_ptr.hbm [resolvable:$true] %s23_s8 }
   0x5   :  { %s36_s28 = sshll.u32 %s477_s27, 4  ;;  %s478_s9 = smov [#allocation2]   ;;  %s37_s28 = int_to_ptr.vmem [resolvable:$true] %s36_s28 }
   0x6   :  { %39 = dma.hbm_to_vmem [thread:$0]  %s35_s26, 128, %s37_s28, [#allocation6]  }
   0x7   :  { %s25_s10 = sshll.u32 %s478_s9, 4  ;;  %s44_s13 = sshll.u32 %s575_s2, 4  ;;  %s26_s10 = int_to_ptr.vmem [resolvable:$true] %s25_s10  ;;  %s45_s13 = int_to_ptr.hbm [resolvable:$true] %s44_s13 }
   0x8   :  { %28 = dma.hbm_to_vmem [thread:$0]  %s24_s8, 128, %s26_s10, [#allocation3]  }
   0x9   :  { %s479_s1 = smov [#allocation7]   ;;  %s62_s17 = sshll.u32 %s578_s5, 4  ;;  %s63_s17 = int_to_ptr.hbm [resolvable:$true] %s62_s17 }
   0xa   :  { %s46_s14 = sshll.u32 %s479_s1, 4  ;;  %s480_s18 = smov 64   ;;  %s47_s14 = int_to_ptr.vmem [resolvable:$true] %s46_s14 }
   0xb   :  { %s481_s0 = smov 4   ;;  %s482_s19 = smov [#allocation8]  }
   0xc   :  { %52 = dma.hbm_to_vmem [thread:$0]  %s45_s13, 512, %s47_s14, [#allocation6], %s480_s18, %s480_s18, %s481_s0  }
   0xd   :  { %s64_s20 = sshll.u32 %s482_s19, 4  ;;  %s65_s20 = int_to_ptr.vmem [resolvable:$true] %s64_s20 }
   0xe   :  { %67 = dma.hbm_to_vmem [thread:$0]  %s63_s17, 16, %s65_s20, [#allocation9]  }
   0xf   :  { %467 = dma.done.wait [#allocation3], 128  }
  0x10   :  { %468 = vsyncadd [#allocation3], 4294967168 }
  0x11   :  { %469 = dma.done.wait [#allocation6], 640  }
  0x12   :  { %470 = vsyncadd [#allocation6], 4294966656 }
  0x13   :  { %471 = dma.done.wait [#allocation9], 16  }
  0x14   :  { %472 = vsyncadd [#allocation9], 4294967280  ;;  %v86_v0 = vld [vmem:[#allocation5] sm:$0xff]  ;;  %s483_s2 = smov 32   ;;  %v300_v3 = vld [vmem:[#allocation7 + $0x10] sm:$0xff]  ;;  %vm94_vm0 = vcmask 261120  }
  0x15   :  { %v301_v1 = vld [vmem:[#allocation7 + $0x18] sm:$0xff]  ;;  %v88_v2 = vpack.c.bf16 %v86_v0, %v86_v0  ;;  %187 = vrot.lane.b32.xlu2 %v86_v0, %s483_s2  ;;  %v299_v6 = vld [vmem:[#allocation7 + $0x8] sm:$0xff]  ;;  %v298_v7 = vld [vmem:[#allocation7] sm:$0xff]  ;;  %vm134_vm1 = vcmask 523264   ;;  %s263_s27 = sshll.u32 %s580_s7, 4  ;;  %s486_s28 = smov [#allocation10]   ;;  %s264_s27 = int_to_ptr.hbm [resolvable:$true] %s263_s27 }
  0x16   :  { %141 = vmatpush.bf16.msra.mxu0 %v301_v1  ;;  %v543_v8 = vld [vmem:[#allocation2] sm:$0xff]  ;;  %v314_v44 = vld [vmem:[#allocation8] ss:$0 sm:$0xff]  ;;  %s250_s29 = sshll.u32 %s486_s28, 4  ;;  %s252_s7 = sshll.u32 %s579_s6, 4  ;;  %s251_s29 = int_to_ptr.vmem [resolvable:$true] %s250_s29  ;;  %s253_s7 = int_to_ptr.hbm [resolvable:$true] %s252_s7 }
  0x17   :  { %v90_v4 = vunpack.c.l.b16 %v88_v2  ;;  %v87_v9 = vpack.c.bf16 %v543_v8, %v543_v8  ;;  %v312_v12 = vld [vmem:[%s576_s3] ss:$0 sm:$0xff]  ;;  %s484_s3 = smov 96  }
  0x18   :  { %v313_v41 = vld [vmem:[%s577_s4] ss:$0 sm:$0xff]  ;;  %s485_s4 = smov [#allocation11]  }
  0x19   :  { %v91_v5 = vpack.c.b16 %v90_v4, %v90_v4  ;;  %s261_s24 = sshll.u32 %s485_s4, 4  ;;  %s262_s24 = int_to_ptr.vmem [resolvable:$true] %s261_s24 }
  0x1a   :  { %142 = vmatpush.bf16.msra.mxu0 %v300_v3 }
  0x1b   :  { %92 = vrot.lane.b32.xlu0 %v91_v5, %s483_s2 }
  0x1e   :  { %143 = vmatpush.bf16.msra.mxu0 %v299_v6 }
  0x22   :  { %144 = vmatpush.bf16.msra.mxu0 %v298_v7 }
  0x6f   :  { %v188_v34 = vpop.permute.xlu2 %187 }
  0x8d   :  { %v93_v10 = vpop.permute.xlu0 %92 }
  0x8e   :  { %v97_v11 = vsel %vm94_vm0, %v87_v9, %v93_v10 }
  0x8f   :  { %296 = vmatmul.msk.bf16.vlgmr.msra.gmra.mxu0 %vm134_vm1, %v97_v11 }
 0x10c   :  { %v146_v13 = vpop.f32.mrf.mxu0 }
 0x10d   :  { %v147_v14 = vadd.f32 %v312_v12, %v146_v13 }
 0x10f   :  { %170 = vrot.lane.b32.xlu0 %v147_v14, %s483_s2  ;;  %v297_v16 = vmul.f32 -1.442695, %v147_v14 }
 0x111   :  { %315 = vpow2.f32 %v297_v16 }
 0x114   :  { %v148_v15 = vpop.f32.mrf.mxu0 }
 0x117   :  { %v316_v17 = vpop.eup %315 }
 0x118   :  { %v153_v18 = vadd.f32 1.0, %v316_v17 }
 0x11a   :  { %317 = vrcp.f32 %v153_v18  ;;  %v165_v24 = vand.u32 2147483648, %v153_v18  ;;  %vm159_vm3 = vweird.f32 %v153_v18  ;;  %v163_v25 = vand.u32 2147483647, %v153_v18 }
 0x11c   :  { %v166_v27 = vor.u32 1.1754944e-38, %v165_v24  ;;  %vm164_vm5 = vcmp.eq.f32.partialorder %v163_v25, 8.507059e+37 }
 0x120   :  { %v318_v19 = vpop.eup %317 }
 0x121   :  { %v155_v20 = vmul.f32 %v318_v19, %v153_v18  ;;  %vm160_vm2 = vweird.f32 %v318_v19 }
 0x122   :  { %vm161_vm4 = vmor %vm159_vm3, %vm160_vm2 }
 0x123   :  { %v156_v21 = vsub.f32 1.0, %v155_v20 }
 0x125   :  { %v157_v22 = vmul.f32 %v318_v19, %v156_v21 }
 0x127   :  { %v158_v23 = vadd.f32 %v318_v19, %v157_v22 }
 0x129   :  { %v162_v26 = vsel %vm161_vm4, %v318_v19, %v158_v23 }
 0x12a   :  { %v167_v28 = vsel %vm164_vm5, %v166_v27, %v162_v26 }
 0x12b   :  { %v180_v35 = vsub.f32 1.0, %v167_v28  ;;  %v190_v37 = vmul.f32 %v188_v34, %v167_v28 }
 0x181   :  { %v171_v29 = vpop.permute.xlu0 %170 }
 0x182   :  { %v173_v30 = vmul.f32 %v171_v29, %v167_v28 }
 0x184   :  { %175 = vrot.lane.b32.xlu1 %v173_v30, %s480_s18 }
 0x1f6   :  { %v176_v31 = vpop.permute.xlu1 %175 }
 0x1f7   :  { %v178_v32 = vadd.f32 %v176_v31, %v147_v14 }
 0x1f9   :  { %319 = vtanh.f32 %v178_v32 }
 0x1ff   :  { %v320_v33 = vpop.eup %319 }
 0x200   :  { %182 = vrot.lane.b32.xlu1 %v320_v33, %s484_s3 }
 0x272   :  { %v183_v36 = vpop.permute.xlu1 %182 }
 0x273   :  { %v185_v38 = vmul.f32 %v183_v36, %v180_v35 }
 0x275   :  { %v191_v39 = vadd.f32 %v190_v37, %v185_v38 }
 0x277   :  { %193 = vrot.lane.b32.xlu2 %v191_v39, %s484_s3  ;;  %v200_v40 = vmul.f32 %v191_v39, %v191_v39 }
 0x279   :  { %202 = vrot.lane.b32.xlu0 %v200_v40, %s484_s3 }
 0x281   :  { %227 = vrot.lane.b32.xlu0 %v313_v41, %s483_s2 }
 0x289   :  { %234 = vrot.lane.b32.xlu0 %v314_v44, %s483_s2 }
 0x2d1   :  { %v194_v42 = vpop.permute.xlu2 %193 }
 0x2d2   :  { %244 = vst.msk [vmem:[#allocation11] sm:$0xff] %vm94_vm0, %v194_v42  ;;  %v196_v43 = vsel %vm94_vm0, %v194_v42, 0.0 }
 0x2d3   :  { %197 = vadd.xlane.f32.xlu1 %v196_v43  ;;  %266 = dma.vmem_to_hbm [thread:$0]  %s262_s24, 128, %s264_s27, [#allocation12]  }
 0x2eb   :  { %v203_v45 = vpop.permute.xlu0 %202 }
 0x2ec   :  { %v205_v46 = vsel %vm94_vm0, %v203_v45, 0.0 }
 0x2ed   :  { %206 = vadd.xlane.f32.xlu2 %v205_v46 }
 0x2f3   :  { %v228_v57 = vpop.permute.xlu0 %227 }
 0x2fb   :  { %v235_v0 = vpop.permute.xlu0 %234 }
 0x346   :  { %v198_v47 = vpop.xlane.xlu1 %197 }
 0x347   :  { %v199_v48 = vmul.f32 0.03125, %v198_v47 }
 0x349   :  { %v209_v50 = vmul.f32 %v199_v48, %v199_v48  ;;  %v211_v61 = vsub.f32 %v191_v39, %v199_v48 }
 0x360   :  { %v207_v49 = vpop.xlane.xlu2 %206 }
 0x361   :  { %v208_v51 = vmul.f32 0.03125, %v207_v49 }
 0x363   :  { %v210_v52 = vsub.f32 %v208_v51, %v209_v50 }
 0x365   :  { %v212_v53 = vadd.f32 1e-05, %v210_v52 }
 0x367   :  { %321 = vrsqrt.f32 %v212_v53  ;;  %vm219_vm7 = vweird.f32 %v212_v53 }
 0x36d   :  { %v322_v54 = vpop.eup %321 }
 0x36e   :  { %v214_v55 = vmul.f32 %v322_v54, %v212_v53  ;;  %vm220_vm6 = vweird.f32 %v322_v54 }
 0x36f   :  { %vm221_vm8 = vmor %vm219_vm7, %vm220_vm6 }
 0x370   :  { %v215_v56 = vmul.f32 %v322_v54, %v214_v55 }
 0x372   :  { %v216_v58 = vmul.f32 0.5, %v215_v56 }
 0x374   :  { %v217_v59 = vsub.f32 1.5, %v216_v58 }
 0x376   :  { %v218_v60 = vmul.f32 %v322_v54, %v217_v59 }
 0x378   :  { %v222_v62 = vsel %vm221_vm8, %v322_v54, %v218_v60 }
 0x379   :  { %v223_v63 = vmul.f32 %v222_v62, %v211_v61 }
 0x37b   :  { %v230_v1 = vmul.f32 %v228_v57, %v223_v63 }
 0x37d   :  { %v237_v2 = vadd.f32 %v235_v0, %v230_v1 }
 0x37f   :  { %239 = vrot.lane.b32.xlu0 %v237_v2, %s484_s3 }
 0x3f1   :  { %v240_v3 = vpop.permute.xlu0 %239 }
 0x3f2   :  { %v242_v4 = vadd.f32 %v240_v3, %v543_v8 }
 0x3f4   :  { %243 = vst.msk [vmem:[#allocation10] sm:$0xff] %vm94_vm0, %v242_v4 }
 0x3f5   :  { %255 = dma.vmem_to_hbm [thread:$0]  %s251_s29, 128, %s253_s7, [#allocation4]  }
 0x3f6   :  { %473 = dma.done.wait [#allocation4], 128  }
 0x3f7   :  { %474 = vsyncadd [#allocation4], 4294967168 }
 0x3f8   :  { %475 = dma.done.wait [#allocation12], 128  }
 0x3f9   :  { %476 = vsyncadd [#allocation12], 4294967168 }
 0x3fa   :  { %275 = vsyncpa [#allocation3], 1 }
 0x3fb   :  { %276 = vsyncpa [#allocation6], 1 }
 0x3fc   :  { %277 = vsyncpa [#allocation9], 1 }
 0x3fd   :  { %278 = vsyncpa [#allocation4], 1 }
 0x3fe   :  { %279 = vsyncpa [#allocation12], 1 }

</bundles_post_ra>
